<compile_context>
chip_gen: v7x
topology: tpu7x:2x2x1
jax: 0.10.0
libtpu: 0.0.40
codegen_flags: <defaults>
</compile_context>

<pallas_src>
import numpy as np
import jax
import jax.numpy as jnp
from jax import lax
from jax.experimental import pallas as pl
from jax.experimental.pallas import tpu as pltpu


def residual_block_kernel(x_ref, b1_ref, b2_ref, bs_ref, bias1_ref, bias2_ref,
                          out_ref, mid_ref):
    """Fused residual block for a chunk of NB images (flattened width*channel layout).

    x_ref    : (NB, H+2, W*Cin)    input, zero-padded along H, (w, ci) flat on lanes
    b1_ref   : (3, W*Cin, W*Cout)  conv1 Toeplitz weights (BN1 scale folded in)
    b2_ref   : (3, W*Cout, W*Cout) conv2 Toeplitz weights (BN2 scale folded in)
    bs_ref   : (W*Cin, W*Cout)     1x1 shortcut block-diagonal weights (BNs scale folded)
    bias1_ref: (1, W*Cout)         folded conv1 + BN1 bias
    bias2_ref: (1, W*Cout)         folded (conv2 + BN2) + (shortcut + BNs) bias
    out_ref  : (NB, H, W*Cout)
    mid_ref  : (H+2, W*Cout)       VMEM scratch holding the H-padded conv1 output
    """
    NB, H, WCo = out_ref.shape
    Hp = x_ref.shape[1]

    # Only the two halo rows of the scratch need zeroing; the interior rows are
    # fully overwritten every step (no full-buffer re-zero).
    zero_row = jnp.zeros((1, WCo), jnp.float32)
    mid_ref[0:1, :] = zero_row
    mid_ref[Hp - 1:Hp, :] = zero_row

    for nb in range(NB):
        # ---- conv1 (3x3, SAME) with BN1 scale folded: 3 row-shifted Toeplitz dots
        acc1 = jnp.zeros((H, WCo), jnp.float32)
        for dy in range(3):
            acc1 = acc1 + jnp.dot(x_ref[nb, dy:dy + H, :], b1_ref[dy],
                                  preferred_element_type=jnp.float32)
        h1 = jnp.maximum(acc1 + bias1_ref[...], 0.0)           # + BN1 bias, ReLU

        # ---- height-pad the intermediate via the small VMEM scratch --------------
        mid_ref[1:H + 1, :] = h1

        # ---- shortcut: 1x1 conv (+ BNs scale) on the un-padded input rows --------
        acc2 = jnp.dot(x_ref[nb, 1:H + 1, :], bs_ref[...],
                       preferred_element_type=jnp.float32)

        # ---- conv2 (3x3, SAME) with BN2 scale folded ------------------------------
        for dy in range(3):
            acc2 = acc2 + jnp.dot(mid_ref[dy:dy + H, :], b2_ref[dy],
                                  preferred_element_type=jnp.float32)

        # ---- folded biases (+ residual already summed), final ReLU, dense store ---
        out_ref[nb, :, :] = jnp.maximum(acc2 + bias2_ref[...], 0.0)


def residual_block_forward(x_nchw, packed, *, batch_block=1):
    """x_nchw: (N, Cin, H, W) float32 -> (N, Cout, H, W) float32."""
    N, Cin, H, W = x_nchw.shape
    WCi = W * Cin
    WCo = packed["B1"].shape[2]
    Cout = WCo // W
    Hp = H + 2

    NB = batch_block
    assert N % NB == 0, "batch must be divisible by batch_block"

    # NCHW -> NHWC -> flatten (W, Cin) onto the lane axis, zero-pad along H by 1.
    xf = jnp.transpose(x_nchw, (0, 2, 3, 1)).reshape(N, H, WCi)
    xp = jnp.pad(xf, ((0, 0), (1, 1), (0, 0)))

    out_flat = pl.pallas_call(
        residual_block_kernel,
        out_shape=jax.ShapeDtypeStruct((N, H, WCo), jnp.float32),
        grid=(N // NB,),
        in_specs=[
            pl.BlockSpec((NB, Hp, WCi), lambda n: (n, 0, 0)),
            pl.BlockSpec((3, WCi, WCo), lambda n: (0, 0, 0)),
            pl.BlockSpec((3, WCo, WCo), lambda n: (0, 0, 0)),
            pl.BlockSpec((WCi, WCo), lambda n: (0, 0)),
            pl.BlockSpec((1, WCo), lambda n: (0, 0)),
            pl.BlockSpec((1, WCo), lambda n: (0, 0)),
        ],
        out_specs=pl.BlockSpec((NB, H, WCo), lambda n: (n, 0, 0)),
        scratch_shapes=[pltpu.VMEM((Hp, WCo), jnp.float32)],
        compiler_params=pltpu.CompilerParams(
            dimension_semantics=("parallel",),        # independent images; 2 TCs on v7x
            vmem_limit_bytes=32 * 1024 * 1024),
    )(xp, packed["B1"], packed["B2"], packed["Bs"],
      packed["bias1"], packed["bias2"])

    out = out_flat.reshape(N, H, W, Cout)
    return jnp.transpose(out, (0, 3, 1, 2))            # -> NCHW


# ----------------------------- parameter handling ------------------------------------

def make_raw_params(key, cin, cout, eps=1e-5):
    """Deterministic synthetic init matching the PyTorch module's shapes,
    with eval-mode BatchNorm folded into per-channel (scale, bias)."""
    ks = jax.random.split(key, 9)

    def uniform(k, shape, bound):
        return jax.random.uniform(k, shape, jnp.float32, -bound, bound)

    def bn_params(k):
        k1, k2, k3, k4 = jax.random.split(k, 4)
        gamma = jax.random.uniform(k1, (cout,), jnp.float32, 0.5, 1.5)
        beta = uniform(k2, (cout,), 0.5)
        mean = 0.1 * jax.random.normal(k3, (cout,), jnp.float32)
        var = jax.random.uniform(k4, (cout,), jnp.float32, 0.5, 1.5)
        return gamma, beta, mean, var

    def fold(conv_bias, bn):
        gamma, beta, mean, var = bn
        scale = gamma / jnp.sqrt(var + eps)
        bias = (conv_bias - mean) * scale + beta
        return jnp.stack([scale, bias], axis=0)         # (2, cout)

    b1w = 1.0 / np.sqrt(cin * 9)
    w1_oihw = uniform(ks[0], (cout, cin, 3, 3), b1w)
    b1 = uniform(ks[1], (cout,), b1w)
    b2w = 1.0 / np.sqrt(cout * 9)
    w2_oihw = uniform(ks[2], (cout, cout, 3, 3), b2w)
    b2 = uniform(ks[3], (cout,), b2w)
    bsw = 1.0 / np.sqrt(cin)
    ws_oihw = uniform(ks[4], (cout, cin, 1, 1), bsw)
    bs = uniform(ks[5], (cout,), bsw)

    return {
        "w1": jnp.transpose(w1_oihw, (2, 3, 1, 0)),       # (3,3,cin,cout)  HWIO
        "w2": jnp.transpose(w2_oihw, (2, 3, 1, 0)),       # (3,3,cout,cout)
        "ws": jnp.transpose(ws_oihw[:, :, 0, 0], (1, 0)), # (cin,cout)
        "sb1": fold(b1, bn_params(ks[6])),
        "sb2": fold(b2, bn_params(ks[7])),
        "sbs": fold(bs, bn_params(ks[8])),
    }


def _conv3_toeplitz(w_hwio, scale, W):
    """(3,3,Ci,Co) SAME-conv weights -> (3, W*Ci, W*Co) per-dy Toeplitz matrices.
    The 3 dx taps and the width-direction zero padding are folded into the matrix;
    the per-output-channel BN scale is folded into the columns."""
    Ci, Co = w_hwio.shape[2], w_hwio.shape[3]
    w = w_hwio * scale[None, None, None, :]
    wi = jnp.arange(W)[:, None]              # input column  w'
    wo = jnp.arange(W)[None, :]              # output column w
    dx = wi - wo + 1                         # tap index; valid taps are 0..2
    valid = (dx >= 0) & (dx <= 2)
    T = w[:, jnp.clip(dx, 0, 2)]                             # (3, W', W, Ci, Co)
    T = jnp.where(valid[None, :, :, None, None], T, 0.0)
    T = jnp.transpose(T, (0, 1, 3, 2, 4))                    # (3, W', Ci, W, Co)
    return T.reshape(3, W * Ci, W * Co)


def _conv1_blockdiag(ws, scale, W):
    """(Ci,Co) 1x1-conv weights -> (W*Ci, W*Co) block-diagonal matrix with BN scale."""
    Ci, Co = ws.shape
    wsf = ws * scale[None, :]
    eye = jnp.eye(W, dtype=wsf.dtype)
    B = eye[:, None, :, None] * wsf[None, :, None, :]        # (W', Ci, W, Co)
    return B.reshape(W * Ci, W * Co)


def pack_params(raw, W):
    """Fold BN scales into lane-flattened weight matrices and biases into lane vectors."""
    cout = raw["w1"].shape[3]
    return {
        "B1": _conv3_toeplitz(raw["w1"], raw["sb1"][0], W),
        "B2": _conv3_toeplitz(raw["w2"], raw["sb2"][0], W),
        "Bs": _conv1_blockdiag(raw["ws"], raw["sbs"][0], W),
        "bias1": jnp.tile(raw["sb1"][1], W).reshape(1, W * cout),
        "bias2": jnp.tile(raw["sb2"][1] + raw["sbs"][1], W).reshape(1, W * cout),
    }


# ----------------------------- reference & test --------------------------------------

def reference_forward(x_nchw, raw):
    """Pure-JAX reference (same folded-BN math) for a sanity check."""
    x = jnp.transpose(x_nchw, (0, 2, 3, 1))
    dn = ("NHWC", "HWIO", "NHWC")

    def conv(y, w):
        return lax.conv_general_dilated(
            y, w, window_strides=(1, 1), padding="SAME",
            dimension_numbers=dn, precision=lax.Precision.HIGHEST)

    h = conv(x, raw["w1"]) * raw["sb1"][0] + raw["sb1"][1]
    h = jnp.maximum(h, 0.0)
    h = conv(h, raw["w2"]) * raw["sb2"][0] + raw["sb2"][1]
    sc = jnp.einsum("nhwc,co->nhwo", x, raw["ws"],
                    precision=lax.Precision.HIGHEST)
    sc = sc * raw["sbs"][0] + raw["sbs"][1]
    out = jnp.maximum(h + sc, 0.0)
    return jnp.transpose(out, (0, 3, 1, 2))


if __name__ == "__main__":
    N, Cin, Cout, H, W = 2, 4, 8, 16, 16

    key = jax.random.PRNGKey(0)
    kx, kp = jax.random.split(key)
    x = jax.random.normal(kx, (N, Cin, H, W), jnp.float32)
    raw = make_raw_params(kp, Cin, Cout)
    packed = pack_params(raw, W)

    out = residual_block_forward(x, packed, batch_block=1)
    out = jax.block_until_ready(out)

    ref = reference_forward(x, raw)
    np.testing.assert_allclose(np.asarray(out), np.asarray(ref),
                               rtol=5e-3, atol=2e-2)

    print("KERNEL_OK")
</pallas_src>

<mosaic_0001>
module attributes {stable_mosaic.version = 11 : i64} {
  func.func @residual_block_kernel(%arg0: i32, %arg1: memref<1x18x64xf32, #tpu.memory_space<vmem>>, %arg2: memref<3x64x128xf32, #tpu.memory_space<vmem>>, %arg3: memref<3x128x128xf32, #tpu.memory_space<vmem>>, %arg4: memref<64x128xf32, #tpu.memory_space<vmem>>, %arg5: memref<1x128xf32, #tpu.memory_space<vmem>>, %arg6: memref<1x128xf32, #tpu.memory_space<vmem>>, %arg7: memref<1x16x128xf32, #tpu.memory_space<vmem>>, %arg8: memref<18x128xf32, #tpu.memory_space<vmem>>) attributes {dimension_semantics = [#tpu.dimension_semantics<parallel>], iteration_bounds = array<i64: 2>, scalar_prefetch = 0 : i64, scratch_operands = 1 : i64, tpu.core_type = #tpu.core_type<tc>, window_params = [{transform_indices = @transform_0, window_bounds = array<i64: 1, 18, 64>}, {pipeline_mode = #tpu.pipeline_mode<synchronous>, transform_indices = @transform_1, window_bounds = array<i64: 3, 64, 128>}, {pipeline_mode = #tpu.pipeline_mode<synchronous>, transform_indices = @transform_2, window_bounds = array<i64: 3, 128, 128>}, {pipeline_mode = #tpu.pipeline_mode<synchronous>, transform_indices = @transform_3, window_bounds = array<i64: 64, 128>}, {pipeline_mode = #tpu.pipeline_mode<synchronous>, transform_indices = @transform_4, window_bounds = array<i64: 1, 128>}, {pipeline_mode = #tpu.pipeline_mode<synchronous>, transform_indices = @transform_5, window_bounds = array<i64: 1, 128>}, {transform_indices = @transform_6, window_bounds = array<i64: 1, 16, 128>}]} {
    %cst = arith.constant 0.000000e+00 : f32
    %0 = vector.broadcast %cst : f32 to vector<1x128xf32>
    %c0 = arith.constant 0 : index
    %c0_0 = arith.constant 0 : index
    %1 = vector.load %arg8[%c0, %c0_0] : memref<18x128xf32, #tpu.memory_space<vmem>>, vector<1x128xf32>
    tpu.vector_store %arg8[%c0, %c0_0], %0 {strides = array<i32>} : memref<18x128xf32, #tpu.memory_space<vmem>>, vector<1x128xf32>,
    %c17 = arith.constant 17 : index
    %c0_1 = arith.constant 0 : index
    %2 = vector.load %arg8[%c17, %c0_1] : memref<18x128xf32, #tpu.memory_space<vmem>>, vector<1x128xf32>
    tpu.vector_store %arg8[%c17, %c0_1], %0 {strides = array<i32>} : memref<18x128xf32, #tpu.memory_space<vmem>>, vector<1x128xf32>,
    %cst_2 = arith.constant 0.000000e+00 : f32
    %3 = vector.broadcast %cst_2 : f32 to vector<16x128xf32>
    %c0_3 = arith.constant 0 : index
    %c0_4 = arith.constant 0 : index
    %c0_5 = arith.constant 0 : index
    %4 = vector.load %arg1[%c0_3, %c0_4, %c0_5] : memref<1x18x64xf32, #tpu.memory_space<vmem>>, vector<1x16x64xf32>
    %5 = vector.shape_cast %4 : vector<1x16x64xf32> to vector<16x64xf32>
    %c0_6 = arith.constant 0 : index
    %c0_7 = arith.constant 0 : index
    %c0_8 = arith.constant 0 : index
    %6 = vector.load %arg2[%c0_6, %c0_7, %c0_8] : memref<3x64x128xf32, #tpu.memory_space<vmem>>, vector<1x64x128xf32>
    %7 = vector.shape_cast %6 : vector<1x64x128xf32> to vector<64x128xf32>
    %cst_9 = arith.constant dense<0.000000e+00> : vector<16x128xf32>
    %8 = tpu.matmul %5, %7, %cst_9 {dimension_numbers = #tpu.dot_dimension_numbers<[1], [0], [0], [1], [0, 0, 1, 1], [], []>} : vector<16x64xf32>, vector<64x128xf32>, vector<16x128xf32> -> vector<16x128xf32>
    %9 = arith.addf %3, %8 : vector<16x128xf32>
    %c0_10 = arith.constant 0 : index
    %c1 = arith.constant 1 : index
    %c0_11 = arith.constant 0 : index
    %10 = vector.load %arg1[%c0_10, %c1, %c0_11] : memref<1x18x64xf32, #tpu.memory_space<vmem>>, vector<1x16x64xf32>
    %11 = vector.shape_cast %10 : vector<1x16x64xf32> to vector<16x64xf32>
    %c1_12 = arith.constant 1 : index
    %c0_13 = arith.constant 0 : index
    %c0_14 = arith.constant 0 : index
    %12 = vector.load %arg2[%c1_12, %c0_13, %c0_14] : memref<3x64x128xf32, #tpu.memory_space<vmem>>, vector<1x64x128xf32>
    %13 = vector.shape_cast %12 : vector<1x64x128xf32> to vector<64x128xf32>
    %cst_15 = arith.constant dense<0.000000e+00> : vector<16x128xf32>
    %14 = tpu.matmul %11, %13, %cst_15 {dimension_numbers = #tpu.dot_dimension_numbers<[1], [0], [0], [1], [0, 0, 1, 1], [], []>} : vector<16x64xf32>, vector<64x128xf32>, vector<16x128xf32> -> vector<16x128xf32>
    %15 = arith.addf %9, %14 : vector<16x128xf32>
    %c0_16 = arith.constant 0 : index
    %c2 = arith.constant 2 : index
    %c0_17 = arith.constant 0 : index
    %16 = vector.load %arg1[%c0_16, %c2, %c0_17] : memref<1x18x64xf32, #tpu.memory_space<vmem>>, vector<1x16x64xf32>
    %17 = vector.shape_cast %16 : vector<1x16x64xf32> to vector<16x64xf32>
    %c2_18 = arith.constant 2 : index
    %c0_19 = arith.constant 0 : index
    %c0_20 = arith.constant 0 : index
    %18 = vector.load %arg2[%c2_18, %c0_19, %c0_20] : memref<3x64x128xf32, #tpu.memory_space<vmem>>, vector<1x64x128xf32>
    %19 = vector.shape_cast %18 : vector<1x64x128xf32> to vector<64x128xf32>
    %cst_21 = arith.constant dense<0.000000e+00> : vector<16x128xf32>
    %20 = tpu.matmul %17, %19, %cst_21 {dimension_numbers = #tpu.dot_dimension_numbers<[1], [0], [0], [1], [0, 0, 1, 1], [], []>} : vector<16x64xf32>, vector<64x128xf32>, vector<16x128xf32> -> vector<16x128xf32>
    %21 = arith.addf %15, %20 : vector<16x128xf32>
    %c0_22 = arith.constant 0 : index
    %c0_23 = arith.constant 0 : index
    %22 = vector.load %arg5[%c0_22, %c0_23] : memref<1x128xf32, #tpu.memory_space<vmem>>, vector<1x128xf32>
    %23 = vector.broadcast %22 : vector<1x128xf32> to vector<16x128xf32>
    %24 = arith.addf %21, %23 : vector<16x128xf32>
    %cst_24 = arith.constant 0.000000e+00 : f32
    %25 = vector.broadcast %cst_24 : f32 to vector<16x128xf32>
    %26 = arith.maximumf %24, %25 : vector<16x128xf32>
    %c1_25 = arith.constant 1 : index
    %c0_26 = arith.constant 0 : index
    %27 = vector.load %arg8[%c1_25, %c0_26] : memref<18x128xf32, #tpu.memory_space<vmem>>, vector<16x128xf32>
    tpu.vector_store %arg8[%c1_25, %c0_26], %26 {strides = array<i32>} : memref<18x128xf32, #tpu.memory_space<vmem>>, vector<16x128xf32>,
    %c0_27 = arith.constant 0 : index
    %c1_28 = arith.constant 1 : index
    %c0_29 = arith.constant 0 : index
    %28 = vector.load %arg1[%c0_27, %c1_28, %c0_29] : memref<1x18x64xf32, #tpu.memory_space<vmem>>, vector<1x16x64xf32>
    %29 = vector.shape_cast %28 : vector<1x16x64xf32> to vector<16x64xf32>
    %c0_30 = arith.constant 0 : index
    %c0_31 = arith.constant 0 : index
    %30 = vector.load %arg4[%c0_30, %c0_31] : memref<64x128xf32, #tpu.memory_space<vmem>>, vector<64x128xf32>
    %cst_32 = arith.constant dense<0.000000e+00> : vector<16x128xf32>
    %31 = tpu.matmul %29, %30, %cst_32 {dimension_numbers = #tpu.dot_dimension_numbers<[1], [0], [0], [1], [0, 0, 1, 1], [], []>} : vector<16x64xf32>, vector<64x128xf32>, vector<16x128xf32> -> vector<16x128xf32>
    %c0_33 = arith.constant 0 : index
    %c0_34 = arith.constant 0 : index
    %32 = vector.load %arg8[%c0_33, %c0_34] : memref<18x128xf32, #tpu.memory_space<vmem>>, vector<16x128xf32>
    %c0_35 = arith.constant 0 : index
    %c0_36 = arith.constant 0 : index
    %c0_37 = arith.constant 0 : index
    %33 = vector.load %arg3[%c0_35, %c0_36, %c0_37] : memref<3x128x128xf32, #tpu.memory_space<vmem>>, vector<1x128x128xf32>
    %34 = vector.shape_cast %33 : vector<1x128x128xf32> to vector<128x128xf32>
    %cst_38 = arith.constant dense<0.000000e+00> : vector<16x128xf32>
    %35 = tpu.matmul %32, %34, %cst_38 {dimension_numbers = #tpu.dot_dimension_numbers<[1], [0], [0], [1], [0, 0, 1, 1], [], []>} : vector<16x128xf32>, vector<128x128xf32>, vector<16x128xf32> -> vector<16x128xf32>
    %36 = arith.addf %31, %35 : vector<16x128xf32>
    %c1_39 = arith.constant 1 : index
    %c0_40 = arith.constant 0 : index
    %37 = vector.load %arg8[%c1_39, %c0_40] : memref<18x128xf32, #tpu.memory_space<vmem>>, vector<16x128xf32>
    %c1_41 = arith.constant 1 : index
    %c0_42 = arith.constant 0 : index
    %c0_43 = arith.constant 0 : index
    %38 = vector.load %arg3[%c1_41, %c0_42, %c0_43] : memref<3x128x128xf32, #tpu.memory_space<vmem>>, vector<1x128x128xf32>
    %39 = vector.shape_cast %38 : vector<1x128x128xf32> to vector<128x128xf32>
    %cst_44 = arith.constant dense<0.000000e+00> : vector<16x128xf32>
    %40 = tpu.matmul %37, %39, %cst_44 {dimension_numbers = #tpu.dot_dimension_numbers<[1], [0], [0], [1], [0, 0, 1, 1], [], []>} : vector<16x128xf32>, vector<128x128xf32>, vector<16x128xf32> -> vector<16x128xf32>
    %41 = arith.addf %36, %40 : vector<16x128xf32>
    %c2_45 = arith.constant 2 : index
    %c0_46 = arith.constant 0 : index
    %42 = vector.load %arg8[%c2_45, %c0_46] : memref<18x128xf32, #tpu.memory_space<vmem>>, vector<16x128xf32>
    %c2_47 = arith.constant 2 : index
    %c0_48 = arith.constant 0 : index
    %c0_49 = arith.constant 0 : index
    %43 = vector.load %arg3[%c2_47, %c0_48, %c0_49] : memref<3x128x128xf32, #tpu.memory_space<vmem>>, vector<1x128x128xf32>
    %44 = vector.shape_cast %43 : vector<1x128x128xf32> to vector<128x128xf32>
    %cst_50 = arith.constant dense<0.000000e+00> : vector<16x128xf32>
    %45 = tpu.matmul %42, %44, %cst_50 {dimension_numbers = #tpu.dot_dimension_numbers<[1], [0], [0], [1], [0, 0, 1, 1], [], []>} : vector<16x128xf32>, vector<128x128xf32>, vector<16x128xf32> -> vector<16x128xf32>
    %46 = arith.addf %41, %45 : vector<16x128xf32>
    %c0_51 = arith.constant 0 : index
    %c0_52 = arith.constant 0 : index
    %47 = vector.load %arg6[%c0_51, %c0_52] : memref<1x128xf32, #tpu.memory_space<vmem>>, vector<1x128xf32>
    %48 = vector.broadcast %47 : vector<1x128xf32> to vector<16x128xf32>
    %49 = arith.addf %46, %48 : vector<16x128xf32>
    %cst_53 = arith.constant 0.000000e+00 : f32
    %50 = vector.broadcast %cst_53 : f32 to vector<16x128xf32>
    %51 = arith.maximumf %49, %50 : vector<16x128xf32>
    %c0_54 = arith.constant 0 : index
    %c0_55 = arith.constant 0 : index
    %c0_56 = arith.constant 0 : index
    %52 = vector.load %arg7[%c0_54, %c0_55, %c0_56] : memref<1x16x128xf32, #tpu.memory_space<vmem>>, vector<1x16x128xf32>
    %53 = vector.shape_cast %52 : vector<1x16x128xf32> to vector<16x128xf32>
    %54 = vector.shape_cast %51 : vector<16x128xf32> to vector<1x16x128xf32>
    tpu.vector_store %arg7[%c0_54, %c0_55, %c0_56], %54 {strides = array<i32>} : memref<1x16x128xf32, #tpu.memory_space<vmem>>, vector<1x16x128xf32>,
    return
  }
  func.func @transform_0(%arg0: i32) -> (i32, i32, i32) {
    %c0_i32 = arith.constant 0 : i32
    %c0_i32_0 = arith.constant 0 : i32
    %c0_i32_1 = arith.constant 0 : i32
    return %arg0, %c0_i32, %c0_i32_0 : i32, i32, i32
  }
  func.func @transform_1(%arg0: i32) -> (i32, i32, i32) {
    %c0_i32 = arith.constant 0 : i32
    %c0_i32_0 = arith.constant 0 : i32
    %c0_i32_1 = arith.constant 0 : i32
    %c0_i32_2 = arith.constant 0 : i32
    return %c0_i32, %c0_i32_0, %c0_i32_1 : i32, i32, i32
  }
  func.func @transform_2(%arg0: i32) -> (i32, i32, i32) {
    %c0_i32 = arith.constant 0 : i32
    %c0_i32_0 = arith.constant 0 : i32
    %c0_i32_1 = arith.constant 0 : i32
    %c0_i32_2 = arith.constant 0 : i32
    return %c0_i32, %c0_i32_0, %c0_i32_1 : i32, i32, i32
  }
  func.func @transform_3(%arg0: i32) -> (i32, i32) {
    %c0_i32 = arith.constant 0 : i32
    %c0_i32_0 = arith.constant 0 : i32
    %c0_i32_1 = arith.constant 0 : i32
    return %c0_i32, %c0_i32_0 : i32, i32
  }
  func.func @transform_4(%arg0: i32) -> (i32, i32) {
    %c0_i32 = arith.constant 0 : i32
    %c0_i32_0 = arith.constant 0 : i32
    %c0_i32_1 = arith.constant 0 : i32
    return %c0_i32, %c0_i32_0 : i32, i32
  }
  func.func @transform_5(%arg0: i32) -> (i32, i32) {
    %c0_i32 = arith.constant 0 : i32
    %c0_i32_0 = arith.constant 0 : i32
    %c0_i32_1 = arith.constant 0 : i32
    return %c0_i32, %c0_i32_0 : i32, i32
  }
  func.func @transform_6(%arg0: i32) -> (i32, i32, i32) {
    %c0_i32 = arith.constant 0 : i32
    %c0_i32_0 = arith.constant 0 : i32
    %c0_i32_1 = arith.constant 0 : i32
    return %arg0, %c0_i32, %c0_i32_0 : i32, i32, i32
  }
}

</mosaic_0001>

<bundles_post_ra>
// kernel: tpu_custom_call.1
= control target key start
LH: loop header
LB: loop body
LE: loop exit
PB: predicated region body
PF: predicated region fallthrough
CT: control target
= control target key end

     0   :  { %11 = vsyncpa [#allocation4], 0  ;;  %s1989_s0 = inlined_call_operand.vmem [shape: f32[2,18,64], index: 0, kind: input, shape index: {}]   ;;  %s1990_s1 = inlined_call_operand.hbm [shape: f32[3,64,128], index: 1, kind: input, shape index: {}]   ;;  %s1991_s2 = inlined_call_operand.hbm [shape: f32[3,128,128], index: 2, kind: input, shape index: {}]   ;;  %s1992_s3 = inlined_call_operand.vmem [shape: f32[64,128], index: 3, kind: input, shape index: {}]   ;;  %s1993_s4 = inlined_call_operand.vmem [shape: f32[1,128], index: 4, kind: input, shape index: {}]   ;;  %s1994_s5 = inlined_call_operand.vmem [shape: f32[1,128], index: 5, kind: input, shape index: {}]   ;;  %s1995_s6 = inlined_call_operand.hbm [shape: f32[2,16,128], index: 6, kind: output, shape index: {}]  }
   0x1   :  { %12 = vsyncpa [#allocation7], 0 }
   0x2   :  { %13 = vsyncpa [#allocation5], 0 }
   0x3   :  { %15 = vsyncpa [#allocation5 + $0x1], 0  ;;  %s1768_s21 = smov 0   ;;  %s1770_s22 = smov 0  }
   0x4   :  { %s1772_s23 = smov 0   ;;  %s1774_s24 = smov 0  }
   0x5 LB: > { %s1789_s25 = sadd.s32 4294967295, %s1723_s24   ;;  %s1060_s26 = sadd.s32 4294967294, %s1723_s24   ;;  %s1723_s24 = sphi %s1774_s24, %s2013_s24   ;;  %s1719_s23 = sphi %s1772_s23, %s2012_s23   ;;  %s1715_s22 = sphi %s1770_s22, %s2011_s22   ;;  %s1711_s21 = sphi %s1768_s21, %s2010_s21  }
   0x6   : > { %s1793_s27 = sadd.s32 1, %s1723_s24   ;;  %s159_s28 = sadd.s32 1, %s1719_s23 }
   0x7   : > { %s156_s29 = ssub.s32 %s1723_s24, %s1793_s27  ;;  %p169_p0 = scmp.ne.s32.totalorder %s1719_s23, %s1715_s22 }
   0x8   : > { %p157_p1 = scmp.eq.s32.totalorder %s156_s29, 0  ;;  %p170_p2 = scmp.eq.s32.totalorder %s1789_s25, 1 }
   0x9   : > { %p175_p3 = scmp.ne.s32.totalorder %s1715_s22, %s1711_s21  ;;  %p176_p4 = scmp.eq.s32.totalorder %s1060_s26, 1 }
   0xa   : > { %s1804_s30 = scalar_select %p157_p1, %s1719_s23, %s159_s28  }
   0xb   : > { %p1806_p5 = por %p170_p2, %p169_p0  ;;  %p1810_p6 = por %p176_p4, %p175_p3 }
   0xc   : > { %p1061_p7 = scmp.ge.s32.totalorder %s1723_s24, 1  ;;  %p183_p8 = scmp.lt.s32.totalorder %s1723_s24, 3 }
   0xd   : > { %s1999_s7 = scalar_select %p1806_p5, 1, 0 }
   0xe   : > { %s2000_s8 = scalar_select %p1810_p6, 1, 0 }
   0xf   : > { %p1996_p9 = scmp.eq.s32.totalorder %s1789_s25, 0  ;;  %p1817_p10 = pnand %p1061_p7, %p183_p8 }
  0x10   : > { %s1725_s10 = smov [#allocation3]   ;;  %s1726_s13 = smov [#allocation6]  }
  0x11   : > { %s2001_s9 = scalar_select %p1817_p10, 1, 0 }
  0x12   : > { %s195_s11 = sshll.u32 %s1725_s10, 4  ;;  %p1542_p11 = pneg %p1817_p10  ;;  %s196_s11 = int_to_ptr.vmem [resolvable:$true] %s195_s11 }
  0x13   : > { %s208_s14 = sshll.u32 %s1726_s13, 4  ;;  %s1597_s17 = scalar_lea.hbm %s1990_s1, 3072  ;;  %s1829_s14 = int_to_ptr.vmem [resolvable:$true] %s208_s14 }
  0x14   : > { %p1825_p12 = pnand %p1996_p9, %p1542_p11  ;;  %p1598_p13 = scmp.ne.s32.totalorder %s1990_s1, %s1597_s17 }
  0x15   : > { %p1604_p3 = scmp.lt.u32.totalorder %s1597_s17, %s1990_s1 }
  0x16   : > { %p1599_p0 = pneg %p1825_p12 }
  0x18   : > { %p1600_p1 = pnand %p1599_p0, %p1598_p13 }
  0x1a   : > { %p1601_p2 = pneg %p1600_p1 }
  0x1c   : > { %p1606_p4 = pnand %p1604_p3, %p1601_p2 }
  0x1e   : > { %1609 = shalt.err (!%p1606_p4)
}
  0x1f   : > { %s1610_s28 = scalar_lea.vmem %s196_s11, 3072  ;;  %p1618_p9 = scmp.lt.s32.totalorder %s196_s11, %s196_s11 }
  0x20   : > { %p1611_p7 = scmp.ne.s32.totalorder %s196_s11, %s1610_s28  ;;  %p1619_p6 = scmp.lt.s32.totalorder %s1610_s28, %s1610_s28 }
  0x22   : > { %p1613_p8 = pnand %p1611_p7, %p1599_p0  ;;  %p1620_p5 = por %p1619_p6, %p1618_p9 }
  0x24   : > { %p1614_p11 = pneg %p1613_p8 }
  0x26   : > { %p1621_p10 = pnand %p1620_p5, %p1614_p11 }
  0x28   : > { %1624 = shalt.err (!%p1621_p10)
}
  0x29   : > { %s1727_s29 = smov 128   ;;  %s1728_s10 = smov 8  }
  0x2a   : > { %1545 = dma.hbm_to_vmem [thread:$0]  (!%p1825_p12), %s1990_s1, 3072, %s196_s11, [#allocation4], %s1727_s29, %s1727_s29, %s1728_s10  }
  0x2b   : > { %s1625_s18 = scalar_lea.hbm %s1991_s2, 6144 }
  0x2c   : > { %p1626_p13 = scmp.ne.s32.totalorder %s1991_s2, %s1625_s18  ;;  %p1632_p9 = scmp.lt.u32.totalorder %s1625_s18, %s1991_s2 }
  0x2e   : > { %p1628_p5 = pnand %p1626_p13, %p1599_p0 }
  0x30   : > { %p1629_p6 = pneg %p1628_p5 }
  0x32   : > { %p1634_p10 = pnand %p1632_p9, %p1629_p6 }
  0x34   : > { %1637 = shalt.err (!%p1634_p10)
}
  0x35   : > { %s1638_s11 = scalar_lea.vmem %s1829_s14, 6144  ;;  %p1646_p4 = scmp.lt.s32.totalorder %s1829_s14, %s1829_s14 }
  0x36   : > { %p1639_p1 = scmp.ne.s32.totalorder %s1829_s14, %s1638_s11  ;;  %p1647_p7 = scmp.lt.s32.totalorder %s1638_s11, %s1638_s11 }
  0x38   : > { %p1641_p2 = pnand %p1639_p1, %p1599_p0  ;;  %p1648_p8 = por %p1647_p7, %p1646_p4 }
  0x3a   : > { %p1642_p3 = pneg %p1641_p2 }
  0x3c   : > { %p1649_p11 = pnand %p1648_p8, %p1642_p3 }
  0x3e   : > { %1652 = shalt.err (!%p1649_p11)
}
  0x3f   : > { %1548 = dma.hbm_to_vmem [thread:$0]  (!%p1825_p12), %s1991_s2, 6144, %s1829_s14, [#allocation7], %s1727_s29, %s1727_s29, %s1728_s10  }
  0x40   : > { %p2003_p13 = scmp.ne.s32.totalorder %s2001_s9, 0 }
  0x41   : > { %p2004_p5 = scmp.eq.s32.totalorder (!%p2003_p13), %s1789_s25, 0 }
  0x42   : > { %241 = sbr.rel (%p2003_p13) target bundleno = 614 (0x266), region = 44 }
  0x49   : > { %1698 = dma.done.wait (%p2004_p5), [#allocation4], 3072   ;;  %p2005_p0 = pmov %p2004_p5 }
  0x4b   : > { %1700 = vsyncadd (%p2005_p0), [#allocation4], 4294964224  ;;  %p2006_p6 = pmov %p2005_p0 }
  0x4c   : > { %p2007_p9 = pmov %p2005_p0 }
  0x4d   : > { %1702 = dma.done.wait (%p2006_p6), [#allocation7], 6144  }
  0x4e   : > { %1704 = vsyncadd (%p2007_p9), [#allocation7], 4294961152  ;;  %p275_p10 = scmp.lt.s32.totalorder %s1789_s25, 1  ;;  %v295_v0 = vld [vmem:[#allocation3 + $0x40] sm:$0xff]  ;;  %v296_v1 = vld [vmem:[#allocation3 + $0x48] sm:$0xff]  ;;  %vm303_vm0 = vcmask 523264  }
  0x4f   : > { %v297_v2 = vld [vmem:[#allocation3 + $0x50] sm:$0xff]  ;;  %v1361_v3 = vpack.c.bf16 %v296_v1, %v295_v0  ;;  %v298_v4 = vld [vmem:[#allocation3 + $0x58] sm:$0xff]  ;;  %v299_v6 = vld [vmem:[#allocation3 + $0x60] sm:$0xff]  ;;  %s272_s19 = sand.u32 1, %s1715_s22   ;;  %s1085_s15 = sshll.u32 %s1789_s25, 8 }
  0x50   : > { %s276_s12 = scalar_select %p275_p10, %s1789_s25, 1  ;;  %v1365_v5 = vpack.c.bf16 %v298_v4, %v297_v2  ;;  %v300_v7 = vld [vmem:[#allocation3 + $0x68] sm:$0xff]  ;;  %v301_v10 = vld [vmem:[#allocation3 + $0x70] sm:$0xff]  ;;  %v302_v11 = vld [vmem:[#allocation3 + $0x78] sm:$0xff] }
  0x51   : > { %1362 = vmatprep.subr.bf16.mxu0 %v1361_v3  ;;  %v1369_v9 = vpack.c.bf16 %v300_v7, %v299_v6  ;;  %v1373_v12 = vpack.c.bf16 %v302_v11, %v301_v10  ;;  %v284_v13 = vld [vmem:[#allocation3] sm:$0xff]  ;;  %v285_v14 = vld [vmem:[#allocation3 + $0x8] sm:$0xff]  ;;  %v576_v16 = vld [vmem:[%s1992_s3 + $0x8] sm:$0xff]  ;;  %s1068_s20 = sshll.u32 %s272_s19, 4  ;;  %s1946_s29 = scalar_lea.hbm %s1995_s6, %s1085_s15 }
  0x52   : > { %s1531_s14 = smul.u32 24, %s276_s12  ;;  %1364 = vmatpush3.bf16.msra.mxu0 %v1361_v3  ;;  %v575_v15 = vld [vmem:[%s1992_s3] sm:$0xff]  ;;  %v577_v17 = vld [vmem:[%s1992_s3 + $0x10] sm:$0xff]  ;;  %v578_v19 = vld [vmem:[%s1992_s3 + $0x18] sm:$0xff]  ;;  %v1377_v23 = vpack.c.bf16 %v285_v14, %v284_v13  ;;  %s274_s11 = scalar_lea.vmem [#allocation8], %s1068_s20 }
  0x53   : > { %1366 = vmatprep.subr.bf16.mxu0 %v1365_v5  ;;  %v1441_v18 = vpack.c.bf16 %v576_v16, %v575_v15  ;;  %v1445_v20 = vpack.c.bf16 %v578_v19, %v577_v17  ;;  %v579_v21 = vld [vmem:[%s1992_s3 + $0x20] sm:$0xff]  ;;  %v580_v22 = vld [vmem:[%s1992_s3 + $0x28] sm:$0xff]  ;;  %v287_v25 = vld [vmem:[#allocation3 + $0x18] sm:$0xff]  ;;  %s976_s13 = sshll.u32 %s274_s11, 4  ;;  %s1948_s9 = scalar_lea.sflag [#allocation5], %s272_s19  ;;  %s1941_s13 = int_to_ptr.vmem [resolvable:$true] %s976_s13 }
  0x54   : > { %s1893_s10 = scalar_lea.vmem %s1989_s0, %s1531_s14  ;;  %v286_v24 = vld [vmem:[#allocation3 + $0x10] sm:$0xff]  ;;  %v1449_v26 = vpack.c.bf16 %v580_v22, %v579_v21  ;;  %v581_v28 = vld [vmem:[%s1992_s3 + $0x30] sm:$0xff]  ;;  %v582_v29 = vld [vmem:[%s1992_s3 + $0x38] sm:$0xff]  ;;  %s1653_s16 = scalar_lea.vmem %s1941_s13, 256 }
  0x55   : > { %v292_v8 = vld [vmem:[%s1893_s10 + $0x1] sm:$0xff]  ;;  %1442 = vmatprep.subr.bf16.mxu1 %v1441_v18  ;;  %v293_v27 = vld [vmem:[%s1893_s10 + $0x9] sm:$0xff]  ;;  %v1381_v30 = vpack.c.bf16 %v287_v25, %v286_v24  ;;  %v288_v32 = vld [vmem:[#allocation3 + $0x20] sm:$0xff]  ;;  %v1453_v34 = vpack.c.bf16 %v582_v29, %v581_v28  ;;  %p1654_p12 = scmp.ne.s32.totalorder %s1941_s13, %s1653_s16  ;;  %p2008_p1 = scmp.ne.s32.totalorder %s1999_s7, 0 }
  0x56   : > { %1196 = vmatprep.mubr.msk.f32.mxu0 %vm303_vm0, %v292_v8  ;;  %1288 = vmatprep.mubr.msk.f32.mxu1 %vm303_vm0, %v292_v8  ;;  %v282_v31 = vld [vmem:[%s1893_s10] sm:$0xff]  ;;  %v760_v35 = vld [vmem:[#allocation6 + $0x80] sm:$0xff]  ;;  %v290_v38 = vld [vmem:[#allocation3 + $0x30] sm:$0xff]  ;;  %s1730_s25 = smov [#allocation8]  }
  0x57   : > { %1368 = vmatpush3.bf16.msra.mxu0 %v1365_v5  ;;  %1444 = vmatpush3.bf16.msra.mxu1 %v1441_v18  ;;  %v289_v33 = vld [vmem:[#allocation3 + $0x28] sm:$0xff]  ;;  %v291_v39 = vld [vmem:[#allocation3 + $0x38] sm:$0xff]  ;;  %v762_v41 = vld [vmem:[#allocation6 + $0x90] sm:$0xff]  ;;  %p1655_p2 = pnand %p1654_p12, %p2008_p1  ;;  %s1657_s17 = sshll.u32 %s1730_s25, 4  ;;  %s1658_s17 = int_to_ptr.vmem [resolvable:$false] %s1657_s17 }
  0x58   : > { %1370 = vmatprep.subr.bf16.mxu0 %v1369_v9  ;;  %1446 = vmatprep.subr.bf16.mxu1 %v1445_v20  ;;  %v761_v36 = vld [vmem:[#allocation6 + $0x88] sm:$0xff]  ;;  %v1385_v37 = vpack.c.bf16 %v289_v33, %v288_v32  ;;  %v763_v42 = vld [vmem:[#allocation6 + $0x98] sm:$0xff]  ;;  %v1389_v43 = vpack.c.bf16 %v291_v39, %v290_v38  ;;  %v469_v44 = vld [vmem:[#allocation3 + $0x80] sm:$0xff]  ;;  %v1729_v38 = vmov 0.0   ;;  %p1660_p4 = scmp.lt.s32.totalorder %s1941_s13, %s1658_s17 }
  0x59   : > { %v1457_v40 = vpack.c.bf16 %v761_v36, %v760_v35  ;;  %v470_v45 = vld [vmem:[#allocation3 + $0x88] sm:$0xff]  ;;  %v1461_v46 = vpack.c.bf16 %v763_v42, %v762_v41  ;;  %v764_v47 = vld [vmem:[#allocation6 + $0xa0] sm:$0xff]  ;;  %v471_v50 = vld [vmem:[#allocation3 + $0x90] sm:$0xff]  ;;  %280 = vst [vmem:[#allocation2] sm:$0x1] %v1729_v38  ;;  %p1656_p3 = pneg %p1655_p2 }
  0x5a   : > { %v765_v48 = vld [vmem:[#allocation6 + $0xa8] sm:$0xff]  ;;  %v1393_v49 = vpack.c.bf16 %v470_v45, %v469_v44  ;;  %v472_v51 = vld [vmem:[#allocation3 + $0x98] sm:$0xff]  ;;  %v283_v53 = vld [vmem:[%s1893_s10 + $0x8] sm:$0xff]  ;;  %281 = vst [vmem:[#allocation2 + $0x11] sm:$0x1] %v1729_v38 }
  0x5b   : > { %1372 = vmatpush3.bf16.msra.mxu0 %v1369_v9  ;;  %1448 = vmatpush3.bf16.msra.mxu1 %v1445_v20  ;;  %v1465_v52 = vpack.c.bf16 %v765_v48, %v764_v47  ;;  %v766_v54 = vld [vmem:[#allocation6 + $0xb0] sm:$0xff]  ;;  %v767_v55 = vld [vmem:[#allocation6 + $0xb8] sm:$0xff]  ;;  %v1397_v56 = vpack.c.bf16 %v472_v51, %v471_v50  ;;  %v473_v58 = vld [vmem:[#allocation3 + $0xa0] sm:$0xff] }
  0x5c   : > { %1374 = vmatprep.subr.bf16.mxu0 %v1373_v12  ;;  %1450 = vmatprep.subr.bf16.mxu1 %v1449_v26  ;;  %v466_v57 = vld [vmem:[%s1893_s10 + $0x2] sm:$0xff]  ;;  %v1469_v60 = vpack.c.bf16 %v767_v55, %v766_v54  ;;  %v768_v61 = vld [vmem:[#allocation6 + $0xc0] sm:$0xff]  ;;  %v476_v1 = vld [vmem:[#allocation3 + $0xb8] sm:$0xff] }
  0x5d   : > { %v474_v59 = vld [vmem:[#allocation3 + $0xa8] sm:$0xff]  ;;  %v475_v0 = vld [vmem:[#allocation3 + $0xb0] sm:$0xff]  ;;  %v585_v4 = vld [vmem:[#allocation6] sm:$0xff] }
  0x5e   : > { %v769_v62 = vld [vmem:[#allocation6 + $0xc8] sm:$0xff]  ;;  %v1401_v63 = vpack.c.bf16 %v474_v59, %v473_v58  ;;  %v1405_v3 = vpack.c.bf16 %v476_v1, %v475_v0  ;;  %v587_v7 = vld [vmem:[#allocation6 + $0x10] sm:$0xff]  ;;  %v588_v8 = vld [vmem:[#allocation6 + $0x18] sm:$0xff] }
  0x5f   : > { %1376 = vmatpush3.bf16.msra.mxu0 %v1373_v12  ;;  %1452 = vmatpush3.bf16.msra.mxu1 %v1449_v26  ;;  %v1473_v2 = vpack.c.bf16 %v769_v62, %v768_v61  ;;  %v586_v5 = vld [vmem:[#allocation6 + $0x8] sm:$0xff]  ;;  %v467_v9 = vld [vmem:[%s1893_s10 + $0xa] sm:$0xff]  ;;  %v1413_v10 = vpack.c.bf16 %v588_v8, %v587_v7  ;;  %v589_v11 = vld [vmem:[#allocation6 + $0x20] sm:$0xff]  ;;  %s1659_s10 = scalar_lea.vmem %s1658_s17, 512 }
  0x60   : > { %1378 = vmatprep.subr.bf16.mxu0 %v1377_v23  ;;  %1454 = vmatprep.subr.bf16.mxu1 %v1453_v34  ;;  %v1409_v6 = vpack.c.bf16 %v586_v5, %v585_v4  ;;  %v590_v12 = vld [vmem:[#allocation6 + $0x28] sm:$0xff]  ;;  %v591_v14 = vld [vmem:[#allocation6 + $0x30] sm:$0xff]  ;;  %v592_v15 = vld [vmem:[#allocation6 + $0x38] sm:$0xff]  ;;  %p1661_p7 = scmp.lt.s32.totalorder %s1659_s10, %s1653_s16 }
  0x61   : > { %v1417_v13 = vpack.c.bf16 %v590_v12, %v589_v11  ;;  %v1421_v16 = vpack.c.bf16 %v592_v15, %v591_v14  ;;  %v593_v17 = vld [vmem:[#allocation6 + $0x40] sm:$0xff]  ;;  %v594_v18 = vld [vmem:[#allocation6 + $0x48] sm:$0xff]  ;;  %v770_v20 = vld [vmem:[#allocation6 + $0xd0] sm:$0xff] }
  0x62   : > { %1197 = vmatmul.mubr.msk.f32.vlgmr.msra.gmra.mrb[0].mxu0 %vm303_vm0, %v293_v27  ;;  %v1425_v19 = vpack.c.bf16 %v594_v18, %v593_v17  ;;  %v771_v21 = vld [vmem:[#allocation6 + $0xd8] sm:$0xff]  ;;  %v773_v24 = vld [vmem:[#allocation6 + $0xe8] sm:$0xff]  ;;  %v774_v26 = vld [vmem:[#allocation6 + $0xf0] sm:$0xff]  ;;  %p1662_p8 = por %p1661_p7, %p1660_p4 }
  0x63   : > { %1380 = vmatpush3.bf16.msra.mxu0 %v1377_v23  ;;  %1215 = vmatprep.mubr.msk.f32.mxu0 %vm303_vm0, %v282_v31  ;;  %v1477_v22 = vpack.c.bf16 %v771_v21, %v770_v20  ;;  %v772_v23 = vld [vmem:[#allocation6 + $0xe0] sm:$0xff]  ;;  %v595_v28 = vld [vmem:[#allocation6 + $0x50] sm:$0xff]  ;;  %v596_v29 = vld [vmem:[#allocation6 + $0x58] sm:$0xff] }
  0x64   : > { %1382 = vmatprep.subr.bf16.mxu0 %v1381_v30  ;;  %1456 = vmatpush3.bf16.msra.mxu1 %v1453_v34  ;;  %v1481_v25 = vpack.c.bf16 %v773_v24, %v772_v23  ;;  %v1429_v31 = vpack.c.bf16 %v596_v29, %v595_v28  ;;  %v856_v32 = vld [vmem:[#allocation6 + $0x100] sm:$0xff]  ;;  %v857_v33 = vld [vmem:[#allocation6 + $0x108] sm:$0xff]  ;;  %v599_v39 = vld [vmem:[#allocation6 + $0x70] sm:$0xff]  ;;  %p1663_p11 = pnand %p1662_p8, %p1656_p3 }
  0x65   : > { %1458 = vmatprep.subr.bf16.mxu1 %v1457_v40  ;;  %v597_v34 = vld [vmem:[#allocation6 + $0x60] sm:$0xff]  ;;  %v598_v35 = vld [vmem:[#allocation6 + $0x68] sm:$0xff]  ;;  %v1489_v36 = vpack.c.bf16 %v857_v33, %v856_v32  ;;  %v858_v47 = vld [vmem:[#allocation6 + $0x110] sm:$0xff] }
  0x66   : > { %v1076_v42 = vld [vmem:[%s1993_s4] ss:$0 sm:$0xff]  ;;  %v859_v48 = vld [vmem:[#allocation6 + $0x118] sm:$0xff]  ;;  %v862_v55 = vld [vmem:[#allocation6 + $0x130] sm:$0xff] }
  0x67   : > { %1384 = vmatpush3.bf16.msra.mxu0 %v1381_v30  ;;  %1289 = vmatmul.mubr.msk.f32.vlgmr.msra.gmra.mrb[0].mxu1 %vm303_vm0, %v293_v27  ;;  %v775_v27 = vld [vmem:[#allocation6 + $0xf8] sm:$0xff]  ;;  %v1493_v51 = vpack.c.bf16 %v859_v48, %v858_v47  ;;  %v864_v61 = vld [vmem:[#allocation6 + $0x140] sm:$0xff]  ;;  %v865_v62 = vld [vmem:[#allocation6 + $0x148] sm:$0xff] }
  0x68   : > { %1386 = vmatprep.subr.bf16.mxu0 %v1385_v37  ;;  %1460 = vmatpush3.bf16.msra.mxu1 %v1457_v40  ;;  %v1485_v30 = vpack.c.bf16 %v775_v27, %v774_v26  ;;  %v600_v40 = vld [vmem:[#allocation6 + $0x78] sm:$0xff]  ;;  %v866_v0 = vld [vmem:[#allocation6 + $0x150] sm:$0xff]  ;;  %v869_v4 = vld [vmem:[#allocation6 + $0x168] sm:$0xff] }
  0x69   : > { %1462 = vmatprep.subr.bf16.mxu1 %v1461_v46  ;;  %v1437_v41 = vpack.c.bf16 %v600_v40, %v599_v39  ;;  %v867_v1 = vld [vmem:[#allocation6 + $0x158] sm:$0xff] }
  0x6a   : > { %v871_v7 = vld [vmem:[#allocation6 + $0x178] sm:$0xff] }
  0x6b   : > { %1388 = vmatpush3.bf16.msra.mxu0 %v1385_v37  ;;  %v1433_v37 = vpack.c.bf16 %v598_v35, %v597_v34 }
  0x6c   : > { %1390 = vmatprep.subr.bf16.mxu0 %v1389_v43  ;;  %1464 = vmatpush3.bf16.msra.mxu1 %v1461_v46 }
  0x6d   : > { %1466 = vmatprep.subr.bf16.mxu1 %v1465_v52 }
  0x6f   : > { %1392 = vmatpush3.bf16.msra.mxu0 %v1389_v43 }
  0x70   : > { %1394 = vmatprep.subr.bf16.mxu0 %v1393_v49  ;;  %1468 = vmatpush3.bf16.msra.mxu1 %v1465_v52  ;;  %v860_v52 = vld [vmem:[#allocation6 + $0x120] sm:$0xff] }
  0x71   : > { %1470 = vmatprep.subr.bf16.mxu1 %v1469_v60 }
  0x72   : > { %1216 = vmatmul.mubr.msk.f32.vlgmr.msra.gmra.mrb[0].mxu0 %vm303_vm0, %v283_v53  ;;  %v861_v53 = vld [vmem:[#allocation6 + $0x128] sm:$0xff] }
  0x73   : > { %1396 = vmatpush3.bf16.msra.mxu0 %v1393_v49  ;;  %1234 = vmatprep.mubr.msk.f32.mxu0 %vm303_vm0, %v466_v57  ;;  %v1497_v54 = vpack.c.bf16 %v861_v53, %v860_v52 }
  0x74   : > { %1398 = vmatprep.subr.bf16.mxu0 %v1397_v56  ;;  %1472 = vmatpush3.bf16.msra.mxu1 %v1469_v60 }
  0x75   : > { %1474 = vmatprep.subr.bf16.mxu1 %v1473_v2 }
  0x77   : > { %1400 = vmatpush3.bf16.msra.mxu0 %v1397_v56  ;;  %v863_v56 = vld [vmem:[#allocation6 + $0x138] sm:$0xff] }
  0x78   : > { %1402 = vmatprep.subr.bf16.mxu0 %v1401_v63  ;;  %1476 = vmatpush3.bf16.msra.mxu1 %v1473_v2  ;;  %v1501_v60 = vpack.c.bf16 %v863_v56, %v862_v55  ;;  %v1509_v2 = vpack.c.bf16 %v867_v1, %v866_v0 }
  0x79   : > { %1478 = vmatprep.subr.bf16.mxu1 %v1477_v22 }
  0x7b   : > { %1404 = vmatpush3.bf16.msra.mxu0 %v1401_v63  ;;  %v1505_v63 = vpack.c.bf16 %v865_v62, %v864_v61 }
  0x7c   : > { %1406 = vmatprep.subr.bf16.mxu0 %v1405_v3  ;;  %1480 = vmatpush3.bf16.msra.mxu1 %v1477_v22 }
  0x7d   : > { %1482 = vmatprep.subr.bf16.mxu1 %v1481_v25 }
  0x7f   : > { %1408 = vmatpush3.bf16.msra.mxu0 %v1405_v3  ;;  %v868_v3 = vld [vmem:[#allocation6 + $0x160] sm:$0xff] }
  0x80   : > { %1410 = vmatprep.subr.bf16.mxu0 %v1409_v6  ;;  %1484 = vmatpush3.bf16.msra.mxu1 %v1481_v25  ;;  %v1513_v5 = vpack.c.bf16 %v869_v4, %v868_v3 }
  0x81   : > { %1486 = vmatprep.subr.bf16.mxu1 %v1485_v30 }
  0x82   : > { %1235 = vmatmul.mubr.msk.f32.vlgmr.msra.gmra.mrb[0].mxu0 %vm303_vm0, %v467_v9 }
  0x83   : > { %1412 = vmatpush3.bf16.msra.mxu0 %v1409_v6  ;;  %v870_v6 = vld [vmem:[#allocation6 + $0x170] sm:$0xff] }
  0x84   : > { %1414 = vmatprep.subr.bf16.mxu0 %v1413_v10  ;;  %1488 = vmatpush3.bf16.msra.mxu1 %v1485_v30  ;;  %v1517_v8 = vpack.c.bf16 %v871_v7, %v870_v6 }
  0x85   : > { %1490 = vmatprep.subr.bf16.mxu1 %v1489_v36 }
  0x87   : > { %1416 = vmatpush3.bf16.msra.mxu0 %v1413_v10 }
  0x88   : > { %1418 = vmatprep.subr.bf16.mxu0 %v1417_v13 }
  0x8b   : > { %1420 = vmatpush3.bf16.msra.mxu0 %v1417_v13  ;;  %v1079_v13 = vld [vmem:[%s1994_s5] ss:$0 sm:$0xff] }
  0x8c   : > { %1422 = vmatprep.subr.bf16.mxu0 %v1421_v16 }
  0x8f   : > { %1424 = vmatpush3.bf16.msra.mxu0 %v1421_v16 }
  0x90   : > { %1426 = vmatprep.subr.bf16.mxu0 %v1425_v19 }
  0x93   : > { %1428 = vmatpush3.bf16.msra.mxu0 %v1425_v19 }
  0x94   : > { %1430 = vmatprep.subr.bf16.mxu0 %v1429_v31 }
  0x97   : > { %1432 = vmatpush3.bf16.msra.mxu0 %v1429_v31 }
  0x98   : > { %1434 = vmatprep.subr.bf16.mxu0 %v1433_v37 }
  0x9b   : > { %1436 = vmatpush3.bf16.msra.mxu0 %v1433_v37 }
  0x9c   : > { %1438 = vmatprep.subr.bf16.mxu0 %v1437_v41 }
  0x9f   : > { %1440 = vmatpush3.bf16.msra.mxu0 %v1437_v41 }
 0x155   : > { %v1236_v43 = vpop.f32.mrb[0].mxu0 }
 0x156   : > { %v568_v44 = vadd.f32 %v1236_v43, %v1076_v42  ;;  %v549_v45 = vpop.f32.mrb[1].mxu0 }
 0x157   : > { %v567_v46 = vadd.f32 %v1076_v42, %v549_v45 }
 0x158   : > { %v570_v49 = vmax.f32 %v568_v44, 0.0 }
 0x159   : > { %v569_v50 = vmax.f32 %v567_v46, 0.0 }
 0x15a   : > { %572 = vst [vmem:[#allocation2 + $0x9] sm:$0xff] %v570_v49 }
 0x15b   : > { %571 = vst [vmem:[#allocation2 + $0x1] sm:$0xff] %v569_v50  ;;  %1323 = vmatprep.mubr.f32.mxu1 %v569_v50 }
 0x15c   : > { %1324 = vmatmul.mubr.f32.vlgmr.msra.gmra.mrb[0].mxu1 %v570_v49 }
 0x15d   : > { %1492 = vmatpush3.bf16.msra.mxu1 %v1489_v36 }
 0x15e   : > { %1494 = vmatprep.subr.bf16.mxu1 %v1493_v51 }
 0x161   : > { %1496 = vmatpush3.bf16.msra.mxu1 %v1493_v51  ;;  %v854_v9 = vld [vmem:[#allocation2 + $0xa] sm:$0xff] }
 0x162   : > { %v583_v57 = vld [vmem:[#allocation2] sm:$0xff]  ;;  %v584_v58 = vld [vmem:[#allocation2 + $0x8] sm:$0xff]  ;;  %1498 = vmatprep.subr.bf16.mxu1 %v1497_v54 }
 0x163   : > { %v853_v59 = vld [vmem:[#allocation2 + $0x2] sm:$0xff]  ;;  %1269 = vmatprep.mubr.f32.mxu0 %v583_v57 }
 0x164   : > { %1358 = vmatprep.mubr.f32.mxu1 %v853_v59  ;;  %1270 = vmatmul.mubr.f32.vlgmr.msra.gmra.mrb[2].mxu0 %v584_v58 }
 0x165   : > { %1500 = vmatpush3.bf16.msra.mxu1 %v1497_v54 }
 0x166   : > { %1502 = vmatprep.subr.bf16.mxu1 %v1501_v60 }
 0x169   : > { %1504 = vmatpush3.bf16.msra.mxu1 %v1501_v60 }
 0x16a   : > { %1506 = vmatprep.subr.bf16.mxu1 %v1505_v63 }
 0x16d   : > { %1508 = vmatpush3.bf16.msra.mxu1 %v1505_v63 }
 0x16e   : > { %1510 = vmatprep.subr.bf16.mxu1 %v1509_v2 }
 0x171   : > { %1512 = vmatpush3.bf16.msra.mxu1 %v1509_v2 }
 0x172   : > { %1514 = vmatprep.subr.bf16.mxu1 %v1513_v5 }
 0x175   : > { %1516 = vmatpush3.bf16.msra.mxu1 %v1513_v5 }
 0x176   : > { %1518 = vmatprep.subr.bf16.mxu1 %v1517_v8 }
 0x179   : > { %1520 = vmatpush3.bf16.msra.mxu1 %v1517_v8 }
 0x17c   : > { %1359 = vmatmul.mubr.f32.vlgmr.msra.gmra.mrb[0].mxu1 %v854_v9 }
 0x237   : > { %v1271_v10 = vpop.f32.mrb[2].mxu0 }
 0x238   : > { %v667_v11 = vpop.f32.mrb[3].mxu0 }
 0x24f   : > { %v1360_v12 = vpop.f32.mrb[0].mxu1 }
 0x250   : > { %v1521_v14 = vadd.f32 %v1360_v12, %v1271_v10  ;;  %v938_v15 = vpop.f32.mrb[1].mxu1 }
 0x251   : > { %v1522_v16 = vadd.f32 %v938_v15, %v667_v11 }
 0x252   : > { %v957_v17 = vadd.f32 %v1521_v14, %v1079_v13 }
 0x253   : > { %v956_v18 = vadd.f32 %v1522_v16, %v1079_v13 }
 0x254   : > { %v959_v19 = vmax.f32 %v957_v17, 0.0 }
 0x255   : > { %v958_v20 = vmax.f32 %v956_v18, 0.0 }
 0x256   : > { %961 = vst [vmem:[%s274_s11 + $0x8] sm:$0xff] %v959_v19 }
 0x257   : > { %960 = vst [vmem:[%s274_s11] sm:$0xff] %v958_v20 }
 0x258   : > { %1666 = shalt.err (!%p1663_p11)
}
 0x259   : > { %s1667_s18 = scalar_lea.hbm %s1946_s29, 256  ;;  %s1671_s26 = scalar_lea.hbm %s1995_s6, 512 }
 0x25a   : > { %p1668_p13 = scmp.ne.s32.totalorder %s1946_s29, %s1667_s18  ;;  %p1672_p6 = scmp.lt.u32.totalorder %s1946_s29, %s1995_s6 }
 0x25b   : > { %p1673_p9 = scmp.lt.u32.totalorder %s1671_s26, %s1667_s18  ;;  %p1675_p12 = scmp.lt.u32.totalorder %s1667_s18, %s1946_s29 }
 0x25c   : > { %p1669_p5 = pnand %p1668_p13, %p2008_p1 }
 0x25d   : > { %p1674_p10 = por %p1673_p9, %p1672_p6 }
 0x25e   : > { %p1670_p0 = pneg %p1669_p5 }
 0x25f   : > { %p1676_p2 = por %p1675_p12, %p1674_p10 }
 0x261   : > { %p1677_p3 = pnand %p1676_p2, %p1670_p0 }
 0x263   : > { %1680 = shalt.err (!%p1677_p3)
}
 0x264   : > { %s1731_s15 = smov 128   ;;  %s1732_s12 = smov 8  }
 0x265   : > { %1540 = dma.vmem_to_hbm [thread:$0]  (%p2008_p1), %s1941_s13, 256, %s1946_s29, %s1948_s9, %s1731_s15, %s1731_s15, %s1732_s12  }
 0x266 PF: > { %p1557_p4 = scmp.ge.s32.totalorder %s1723_s24, 2  ;;  %s991_s14 = sand.u32 1, %s1711_s21  }
 0x267   : > { %p2009_p7 = scmp.ne.s32.totalorder %s2000_s8, 0  ;;  %s992_s16 = scalar_lea.sflag [#allocation5], %s991_s14 }
 0x269   : > { %p1550_p8 = pnand %p1557_p4, %p2009_p7 }
 0x26b   : > { %1706 = dma.done.wait (!%p1550_p8), %s992_s16, 256  }
 0x26c   : > { %1708 = vsyncadd (!%p1550_p8), %s992_s16, 4294967040  ;;  %p18_p11 = scmp.ge.s32.totalorder %s1793_s27, 4   ;;  %s2010_s21 = smov %s1715_s22 }
 0x26d   : > { %s2011_s22 = smov %s1719_s23  ;;  %s2012_s23 = smov %s1804_s30 }
 0x26e   : > { %s2013_s24 = smov %s1793_s27  ;;  %20 = sbr.rel (!%p18_p11) target bundleno = 5 (0x5), region = 92 }
 0x275   :  { %997 = vsyncpa [#allocation4], 1 }
 0x276   :  { %999 = vsyncpa [#allocation4 + $0x1], 1 }
 0x277   :  { %1000 = vsyncpa [#allocation7], 1 }
 0x278   :  { %1001 = vsyncpa [#allocation5], 1 }
 0x279   :  { %1003 = vsyncpa [#allocation5 + $0x1], 1 }

</bundles_post_ra>
